<compile_context>
chip_gen: v5e
topology: v5e:2x2
jax: 0.10.0
libtpu: 0.0.40
codegen_flags: <defaults>
</compile_context>

<pallas_src>
import jax
import jax.numpy as jnp
from jax.experimental import pallas as pl
from jax.experimental.pallas import tpu as pltpu


# ----------------------------- Pallas kernel -------------------------------

def _actor_kernel(x_ref, w1_ref, b1_ref, w2_ref, b2_ref, wa_ref, ba_ref, o_ref):
    # fc1 + ReLU  (MXU matmul, f32 accumulate; epilogue in f32)
    h = jnp.maximum(
        jnp.dot(x_ref[...], w1_ref[...], preferred_element_type=jnp.float32)
        + b1_ref[...], 0.0)
    # fc2 + ReLU
    h = jnp.maximum(
        jnp.dot(h, w2_ref[...], preferred_element_type=jnp.float32)
        + b2_ref[...], 0.0)
    # fc_action (no activation)
    a = (jnp.dot(h, wa_ref[...], preferred_element_type=jnp.float32)
         + ba_ref[...])

    # Global normalization, matching torch semantics exactly:
    #   (x - x.mean()) / x.std() + 1e-10   with x.std() the UNBIASED (N-1) std.
    n = a.size                              # static Python int
    m = jnp.sum(a) / n
    d = a - m
    var = jnp.sum(d * d) / (n - 1)          # Bessel-corrected, like torch.std()
    o_ref[...] = d / jnp.sqrt(var) + 1e-10


# ----------------------------- wrapper --------------------------------------

def actor_forward(state, params):
    """Fused ActorModel forward: one pallas_call, everything in VMEM."""
    B = state.shape[0]
    A = params["wa"].shape[1]
    vspec = pl.BlockSpec(memory_space=pltpu.MemorySpace.VMEM)
    args = (state,
            params["w1"], params["b1"],
            params["w2"], params["b2"],
            params["wa"], params["ba"])
    # Total VMEM footprint here is well under 1 MiB; the explicit limit keeps
    # the kernel portable to v7x (64 MiB physical / 32 MiB default scoped).
    return pl.pallas_call(
        _actor_kernel,
        out_shape=jax.ShapeDtypeStruct((B, A), jnp.float32),
        in_specs=[vspec] * len(args),
        out_specs=vspec,
        compiler_params=pltpu.CompilerParams(vmem_limit_bytes=32 * 1024 * 1024),
    )(*args)
    # TODO(synk): for large training batches, switch to a batch-tiled grid with
    # a two-pass (sum / sum-of-squares) global normalization instead of the
    # single-block kernel above.


# ----------------------------- reference ------------------------------------

def reference_forward(x, p):
    h = jax.nn.relu(x @ p["w1"] + p["b1"])
    h = jax.nn.relu(h @ p["w2"] + p["b2"])
    a = h @ p["wa"] + p["ba"]
    return (a - a.mean()) / jnp.std(a, ddof=1) + 1e-10


# ----------------------------- setup / main ----------------------------------

def init_params(key, encoding_size, action_size, fc1_units=128, fc2_units=64):
    # Deterministic synthetic init standing in for orthogonal init; shapes match
    # the torch module.  Weights are stored (in, out) so the kernel needs no
    # transposes; biases are zero (like layer_init's constant_(0)); fc_action
    # weights uniform(-0.003, 0.003) like the torch module.
    ks = jax.random.split(key, 4)
    s = 0.1
    p = {
        "w1": s * jax.random.normal(ks[0], (encoding_size, fc1_units), jnp.float32),
        "b1": jnp.zeros((1, fc1_units), jnp.float32),
        "w2": s * jax.random.normal(ks[1], (fc1_units, fc2_units), jnp.float32),
        "b2": jnp.zeros((1, fc2_units), jnp.float32),
        "wa": jax.random.uniform(ks[2], (fc2_units, action_size), jnp.float32,
                                 minval=-0.003, maxval=0.003),
        "ba": jnp.zeros((1, action_size), jnp.float32),
    }
    return p, ks[3]


if __name__ == "__main__":
    B, encoding_size, action_size = 4, 64, 7
    params, data_key = init_params(jax.random.PRNGKey(0),
                                   encoding_size, action_size)
    state = jax.random.normal(data_key, (B, encoding_size), jnp.float32)

    out = actor_forward(state, params)
    out = jax.block_until_ready(out)
    assert out.shape == (B, action_size)

    ref = reference_forward(state, params)
    if not bool(jnp.allclose(out, ref, rtol=2e-3, atol=2e-3)):
        raise AssertionError("Pallas output does not match JAX reference")

    print("KERNEL_OK")
</pallas_src>

<mosaic_0001>
module attributes {stable_mosaic.version = 11 : i64} {
  func.func @_actor_kernel(%arg0: memref<4x64xf32, #tpu.memory_space<vmem>>, %arg1: memref<64x128xf32, #tpu.memory_space<vmem>>, %arg2: memref<1x128xf32, #tpu.memory_space<vmem>>, %arg3: memref<128x64xf32, #tpu.memory_space<vmem>>, %arg4: memref<1x64xf32, #tpu.memory_space<vmem>>, %arg5: memref<64x7xf32, #tpu.memory_space<vmem>>, %arg6: memref<1x7xf32, #tpu.memory_space<vmem>>, %arg7: memref<4x7xf32, #tpu.memory_space<vmem>>) attributes {dimension_semantics = [], scalar_prefetch = 0 : i64, scratch_operands = 0 : i64, tpu.core_type = #tpu.core_type<tc>} {
    %c0 = arith.constant 0 : index
    %c0_0 = arith.constant 0 : index
    %0 = vector.load %arg0[%c0, %c0_0] : memref<4x64xf32, #tpu.memory_space<vmem>>, vector<4x64xf32>
    %c0_1 = arith.constant 0 : index
    %c0_2 = arith.constant 0 : index
    %1 = vector.load %arg1[%c0_1, %c0_2] : memref<64x128xf32, #tpu.memory_space<vmem>>, vector<64x128xf32>
    %cst = arith.constant dense<0.000000e+00> : vector<4x128xf32>
    %2 = tpu.matmul %0, %1, %cst {dimension_numbers = #tpu.dot_dimension_numbers<[1], [0], [0], [1], [0, 0, 1, 1], [], []>} : vector<4x64xf32>, vector<64x128xf32>, vector<4x128xf32> -> vector<4x128xf32>
    %c0_3 = arith.constant 0 : index
    %c0_4 = arith.constant 0 : index
    %3 = vector.load %arg2[%c0_3, %c0_4] : memref<1x128xf32, #tpu.memory_space<vmem>>, vector<1x128xf32>
    %4 = vector.broadcast %3 : vector<1x128xf32> to vector<4x128xf32>
    %5 = arith.addf %2, %4 : vector<4x128xf32>
    %cst_5 = arith.constant 0.000000e+00 : f32
    %6 = vector.broadcast %cst_5 : f32 to vector<4x128xf32>
    %7 = arith.maximumf %5, %6 : vector<4x128xf32>
    %c0_6 = arith.constant 0 : index
    %c0_7 = arith.constant 0 : index
    %8 = vector.load %arg3[%c0_6, %c0_7] : memref<128x64xf32, #tpu.memory_space<vmem>>, vector<128x64xf32>
    %cst_8 = arith.constant dense<0.000000e+00> : vector<4x64xf32>
    %9 = tpu.matmul %7, %8, %cst_8 {dimension_numbers = #tpu.dot_dimension_numbers<[1], [0], [0], [1], [0, 0, 1, 1], [], []>} : vector<4x128xf32>, vector<128x64xf32>, vector<4x64xf32> -> vector<4x64xf32>
    %c0_9 = arith.constant 0 : index
    %c0_10 = arith.constant 0 : index
    %10 = vector.load %arg4[%c0_9, %c0_10] : memref<1x64xf32, #tpu.memory_space<vmem>>, vector<1x64xf32>
    %11 = vector.broadcast %10 : vector<1x64xf32> to vector<4x64xf32>
    %12 = arith.addf %9, %11 : vector<4x64xf32>
    %cst_11 = arith.constant 0.000000e+00 : f32
    %13 = vector.broadcast %cst_11 : f32 to vector<4x64xf32>
    %14 = arith.maximumf %12, %13 : vector<4x64xf32>
    %c0_12 = arith.constant 0 : index
    %c0_13 = arith.constant 0 : index
    %15 = vector.load %arg5[%c0_12, %c0_13] : memref<64x7xf32, #tpu.memory_space<vmem>>, vector<64x7xf32>
    %cst_14 = arith.constant dense<0.000000e+00> : vector<4x7xf32>
    %16 = tpu.matmul %14, %15, %cst_14 {dimension_numbers = #tpu.dot_dimension_numbers<[1], [0], [0], [1], [0, 0, 1, 1], [], []>} : vector<4x64xf32>, vector<64x7xf32>, vector<4x7xf32> -> vector<4x7xf32>
    %c0_15 = arith.constant 0 : index
    %c0_16 = arith.constant 0 : index
    %17 = vector.load %arg6[%c0_15, %c0_16] : memref<1x7xf32, #tpu.memory_space<vmem>>, vector<1x7xf32>
    %18 = vector.broadcast %17 : vector<1x7xf32> to vector<4x7xf32>
    %19 = arith.addf %16, %18 : vector<4x7xf32>
    %20 = vector.shape_cast %19 : vector<4x7xf32> to vector<1x4x7xf32>
    %cst_17 = arith.constant dense<0.000000e+00> : vector<1xf32>
    %21 = vector.multi_reduction <add>, %20, %cst_17 [1, 2] : vector<1x4x7xf32> to vector<1xf32>
    %22 = vector.shape_cast %21 : vector<1xf32> to vector<1x1x1xf32>
    %23 = vector.extract %22[0, 0, 0] : f32 from vector<1x1x1xf32>
    %cst_18 = arith.constant 2.800000e+01 : f32
    %24 = arith.divf %23, %cst_18 : f32
    %25 = vector.broadcast %24 : f32 to vector<4x7xf32>
    %26 = arith.subf %19, %25 : vector<4x7xf32>
    %27 = arith.mulf %26, %26 : vector<4x7xf32>
    %28 = vector.shape_cast %27 : vector<4x7xf32> to vector<1x4x7xf32>
    %cst_19 = arith.constant dense<0.000000e+00> : vector<1xf32>
    %29 = vector.multi_reduction <add>, %28, %cst_19 [1, 2] : vector<1x4x7xf32> to vector<1xf32>
    %30 = vector.shape_cast %29 : vector<1xf32> to vector<1x1x1xf32>
    %31 = vector.extract %30[0, 0, 0] : f32 from vector<1x1x1xf32>
    %cst_20 = arith.constant 2.700000e+01 : f32
    %32 = arith.divf %31, %cst_20 : f32
    %33 = math.sqrt %32 : f32
    %34 = vector.broadcast %33 : f32 to vector<4x7xf32>
    %35 = arith.divf %26, %34 : vector<4x7xf32>
    %cst_21 = arith.constant 1.000000e-10 : f32
    %36 = vector.broadcast %cst_21 : f32 to vector<4x7xf32>
    %37 = arith.addf %35, %36 : vector<4x7xf32>
    %c0_22 = arith.constant 0 : index
    %c0_23 = arith.constant 0 : index
    %38 = vector.load %arg7[%c0_22, %c0_23] : memref<4x7xf32, #tpu.memory_space<vmem>>, vector<4x7xf32>
    tpu.vector_store %arg7[%c0_22, %c0_23], %37 {strides = array<i32>} : memref<4x7xf32, #tpu.memory_space<vmem>>, vector<4x7xf32>,
    return
  }
}

</mosaic_0001>

<bundles_post_ra>
// kernel: tpu_custom_call.1
= control target key start
LH: loop header
LB: loop body
LE: loop exit
PB: predicated region body
PF: predicated region fallthrough
CT: control target
= control target key end

     0   :  { %s442_s0 = inlined_call_operand.vmem [shape: f32[4,64], index: 0, kind: input, shape index: {}]   ;;  %s443_s1 = inlined_call_operand.vmem [shape: f32[64,128], index: 1, kind: input, shape index: {}]   ;;  %s444_s2 = inlined_call_operand.vmem [shape: f32[1,128], index: 2, kind: input, shape index: {}]   ;;  %s445_s3 = inlined_call_operand.vmem [shape: f32[128,64], index: 3, kind: input, shape index: {}]   ;;  %s446_s4 = inlined_call_operand.vmem [shape: f32[1,64], index: 4, kind: input, shape index: {}]   ;;  %s447_s5 = inlined_call_operand.vmem [shape: f32[64,7], index: 5, kind: input, shape index: {}]   ;;  %s448_s6 = inlined_call_operand.vmem [shape: f32[1,7], index: 6, kind: input, shape index: {}]   ;;  %s449_s7 = inlined_call_operand.hbm [shape: f32[4,7], index: 7, kind: output, shape index: {}]  }
   0x1   :  { %v35_v0 = vld [vmem:[%s443_s1 + $0x38] sm:$0xff]  ;;  %v34_v1 = vld [vmem:[%s443_s1 + $0x30] sm:$0xff]  ;;  %v33_v2 = vld [vmem:[%s443_s1 + $0x28] sm:$0xff] }
   0x2   :  { %52 = vmatpush.msra.mxu0 %v35_v0  ;;  %v80_v3 = vld [vmem:[%s445_s3 + $0x78] sm:$0xff]  ;;  %v79_v4 = vld [vmem:[%s445_s3 + $0x70] sm:$0xff]  ;;  %v32_v5 = vld [vmem:[%s443_s1 + $0x20] sm:$0xff] }
   0x3   :  { %85 = vmatpush.msra.mxu1 %v80_v3  ;;  %v78_v6 = vld [vmem:[%s445_s3 + $0x68] sm:$0xff]  ;;  %v31_v7 = vld [vmem:[%s443_s1 + $0x18] sm:$0xff]  ;;  %v30_v8 = vld [vmem:[%s443_s1 + $0x10] sm:$0xff] }
   0x4   :  { %53 = vmatpush.msra.mxu0 %v34_v1  ;;  %v77_v9 = vld [vmem:[%s445_s3 + $0x60] sm:$0xff] }
   0x5   :  { %86 = vmatpush.msra.mxu1 %v79_v4 }
   0x6   :  { %54 = vmatpush.msra.mxu0 %v33_v2 }
   0x7   :  { %87 = vmatpush.msra.mxu1 %v78_v6 }
   0x8   :  { %55 = vmatpush.msra.mxu0 %v32_v5 }
   0x9   :  { %12 = vsyncpa [#allocation3], 0  ;;  %v76_v10 = vld [vmem:[%s445_s3 + $0x58] sm:$0xff]  ;;  %v29_v11 = vld [vmem:[%s443_s1 + $0x8] sm:$0xff]  ;;  %88 = vmatpush.msra.mxu1 %v77_v9  ;;  %vm40_vm0 = vcmask 523264   ;;  %vm141_vm1 = vcmask 52224  }
   0xa   :  { %56 = vmatpush.msra.mxu0 %v31_v7  ;;  %v75_v12 = vld [vmem:[%s445_s3 + $0x50] sm:$0xff]  ;;  %v28_v13 = vld [vmem:[%s443_s1] sm:$0xff]  ;;  %v74_v15 = vld [vmem:[%s445_s3 + $0x48] sm:$0xff]  ;;  %v283_v45 = vmov 28.0   ;;  %v284_v63 = vmov 27.0   ;;  %s285_s25 = smov [#allocation2]  }
   0xb   :  { %89 = vmatpush.msra.mxu1 %v76_v10  ;;  %v27_v14 = vld [vmem:[%s442_s0] sm:$0xf]  ;;  %v72_v17 = vld [vmem:[%s445_s3 + $0x38] sm:$0xff]  ;;  %v71_v18 = vld [vmem:[%s445_s3 + $0x30] sm:$0xff]  ;;  %249 = vrcp.f32 %v283_v45  ;;  %s220_s26 = sshll.u32 %s285_s25, 4  ;;  %s222_s29 = sshll.u32 %s449_s7, 4  ;;  %s221_s26 = int_to_ptr.vmem [resolvable:$true] %s220_s26  ;;  %s223_s29 = int_to_ptr.hbm [resolvable:$true] %s222_s29 }
   0xc   :  { %57 = vmatpush.msra.mxu0 %v30_v8  ;;  %v73_v16 = vld [vmem:[%s445_s3 + $0x40] sm:$0xff]  ;;  %v70_v19 = vld [vmem:[%s445_s3 + $0x28] sm:$0xff]  ;;  %v68_v21 = vld [vmem:[%s445_s3 + $0x18] sm:$0xff]  ;;  %251 = vrcp.f32 %v284_v63 }
   0xd   :  { %90 = vmatpush.msra.mxu1 %v75_v12  ;;  %v69_v20 = vld [vmem:[%s445_s3 + $0x20] sm:$0xff]  ;;  %v67_v22 = vld [vmem:[%s445_s3 + $0x10] sm:$0xff]  ;;  %v66_v23 = vld [vmem:[%s445_s3 + $0x8] sm:$0xff] }
   0xe   :  { %58 = vmatpush.msra.mxu0 %v29_v11  ;;  %v65_v24 = vld [vmem:[%s445_s3] sm:$0xff]  ;;  %v113_v25 = vld [vmem:[%s447_s5 + $0x38] sm:$0xff]  ;;  %v112_v26 = vld [vmem:[%s447_s5 + $0x30] sm:$0xff] }
   0xf   :  { %91 = vmatpush.msra.mxu1 %v74_v15  ;;  %129 = vmatpush.msra.mxu2 %v113_v25  ;;  %v111_v27 = vld [vmem:[%s447_s5 + $0x28] sm:$0xff]  ;;  %v110_v28 = vld [vmem:[%s447_s5 + $0x20] sm:$0xff]  ;;  %v109_v29 = vld [vmem:[%s447_s5 + $0x18] sm:$0xff] }
  0x10   :  { %59 = vmatpush.msra.mxu0 %v28_v13  ;;  %v246_v30 = vld [vmem:[%s444_s2] ss:$0 sm:$0xff]  ;;  %v108_v34 = vld [vmem:[%s447_s5 + $0x10] sm:$0xff]  ;;  %v107_v35 = vld [vmem:[%s447_s5 + $0x8] sm:$0xff] }
  0x11   :  { %231 = vmatmul.msk.f32.vlgmr.msra.gmra.mxu0 %vm40_vm0, %v27_v14  ;;  %92 = vmatpush.msra.mxu1 %v73_v16  ;;  %v106_v36 = vld [vmem:[%s447_s5] sm:$0xff]  ;;  %v250_v46 = vpop.eup %249 }
  0x12   :  { %130 = vmatpush.msra.mxu2 %v112_v26  ;;  %v247_v37 = vld [vmem:[%s446_s4] ss:$0 sm:$0xff]  ;;  %v153_v47 = vmul.f32 28.0, %v250_v46  ;;  %vm157_vm2 = vweird.f32 %v250_v46  ;;  %v252_v0 = vpop.eup %251 }
  0x13   :  { %93 = vmatpush.msra.mxu1 %v72_v17  ;;  %v248_v41 = vld [vmem:[%s448_s6] ss:$0 sm:$0xff]  ;;  %v175_v1 = vmul.f32 27.0, %v252_v0  ;;  %vm179_vm3 = vweird.f32 %v252_v0 }
  0x14   :  { %131 = vmatpush.msra.mxu2 %v111_v27  ;;  %v154_v48 = vsub.f32 1.0, %v153_v47 }
  0x15   :  { %94 = vmatpush.msra.mxu1 %v71_v18  ;;  %v176_v2 = vsub.f32 1.0, %v175_v1 }
  0x16   :  { %132 = vmatpush.msra.mxu2 %v110_v28  ;;  %v155_v52 = vmul.f32 %v250_v46, %v154_v48 }
  0x17   :  { %95 = vmatpush.msra.mxu1 %v70_v19  ;;  %v177_v6 = vmul.f32 %v252_v0, %v176_v2 }
  0x18   :  { %133 = vmatpush.msra.mxu2 %v109_v29  ;;  %v156_v55 = vadd.f32 %v250_v46, %v155_v52 }
  0x19   :  { %96 = vmatpush.msra.mxu1 %v69_v20  ;;  %v178_v9 = vadd.f32 %v252_v0, %v177_v6 }
  0x1a   :  { %134 = vmatpush.msra.mxu2 %v108_v34  ;;  %v158_v58 = vsel %vm157_vm2, %v250_v46, %v156_v55 }
  0x1b   :  { %97 = vmatpush.msra.mxu1 %v68_v21  ;;  %v180_v12 = vsel %vm179_vm3, %v252_v0, %v178_v9 }
  0x1c   :  { %135 = vmatpush.msra.mxu2 %v107_v35 }
  0x1d   :  { %98 = vmatpush.msra.mxu1 %v67_v22 }
  0x1e   :  { %136 = vmatpush.msra.mxu2 %v106_v36 }
  0x1f   :  { %99 = vmatpush.msra.mxu1 %v66_v23 }
  0x21   :  { %100 = vmatpush.msra.mxu1 %v65_v24 }
  0x8e   :  { %v61_v31 = vpop.f32.mrf.mxu0 }
  0x8f   :  { %v62_v32 = vadd.f32 %v246_v30, %v61_v31 }
  0x91   :  { %v64_v33 = vmax.f32 %v62_v32, 0.0 }
  0x93   :  { %101 = vmatmul.f32.vlgmr.msra.gmra.mxu1 %v64_v33 }
 0x110   :  { %v102_v38 = vpop.f32.mrf.mxu1 }
 0x111   :  { %v103_v39 = vadd.f32 %v247_v37, %v102_v38 }
 0x113   :  { %v105_v40 = vmax.f32 %v103_v39, 0.0 }
 0x115   :  { %232 = vmatmul.msk.f32.vlgmr.msra.gmra.mxu2 %vm40_vm0, %v105_v40 }
 0x198   :  { %v138_v42 = vpop.f32.mrf.mxu2 }
 0x199   :  { %v139_v43 = vadd.f32 %v248_v41, %v138_v42 }
 0x19b   :  { %v142_v44 = vsel %vm141_vm1, %v139_v43, 0.0 }
 0x19c   :  { %143 = vadd.xlane.f32.xlu0 %v142_v44 }
 0x20f   :  { %v144_v49 = vpop.xlane.xlu0 %143 }
 0x210   :  { %v145_v50 = vrot.slane %v144_v49, 4 }
 0x212   :  { %v146_v51 = vadd.f32 %v145_v50, %v144_v49 }
 0x214   :  { %v147_v53 = vrot.slane %v146_v51, 2 }
 0x216   :  { %v148_v54 = vadd.f32 %v147_v53, %v146_v51 }
 0x218   :  { %v149_v56 = vrot.slane %v148_v54, 1 }
 0x21a   :  { %v150_v57 = vadd.f32 %v149_v56, %v148_v54 }
 0x21c   :  { %233 = vpush %v150_v57 }
 0x21d   :  { %235 = vpush %v158_v58 }
 0x24d   :  { %s234_s4 = spop %233 }
 0x24e   :  { %s236_s5 = spop %235 }
 0x24f   :  { %s160_s6 = smul.f32 %s236_s5, %s234_s4 }
 0x251   :  { %v161_v59 = vstv %s160_s6 }
 0x252   :  { %v162_v60 = vsub.f32 %v139_v43, %v161_v59 }
 0x254   :  { %v163_v61 = vmul.f32 %v162_v60, %v162_v60 }
 0x256   :  { %v164_v62 = vsel %vm141_vm1, %v163_v61, 0.0 }
 0x257   :  { %165 = vadd.xlane.f32.xlu0 %v164_v62 }
 0x2ca   :  { %v166_v3 = vpop.xlane.xlu0 %165 }
 0x2cb   :  { %v167_v4 = vrot.slane %v166_v3, 4 }
 0x2cd   :  { %v168_v5 = vadd.f32 %v167_v4, %v166_v3 }
 0x2cf   :  { %v169_v7 = vrot.slane %v168_v5, 2 }
 0x2d1   :  { %v170_v8 = vadd.f32 %v169_v7, %v168_v5 }
 0x2d3   :  { %v171_v10 = vrot.slane %v170_v8, 1 }
 0x2d5   :  { %v172_v11 = vadd.f32 %v171_v10, %v170_v8 }
 0x2d7   :  { %237 = vpush %v172_v11 }
 0x2d8   :  { %239 = vpush %v180_v12 }
 0x308   :  { %s238_s21 = spop %237 }
 0x309   :  { %s240_s22 = spop %239 }
 0x30a   :  { %s182_s23 = smul.f32 %s240_s22, %s238_s21 }
 0x30c   :  { %v183_v13 = vstv %s182_s23 }
 0x30d   :  { %253 = vrsqrt.f32 %v183_v13  ;;  %vm191_vm4 = vcmp.eq.f32.partialorder %v183_v13, inf  ;;  %v194_v21 = vand.u32 2147483648, %v183_v13  ;;  %vm193_vm5 = vcmp.eq.f32.partialorder %v183_v13, 0.0 }
 0x313   :  { %v254_v14 = vpop.eup %253 }
 0x314   :  { %v185_v15 = vmul.f32 %v254_v14, %v183_v13 }
 0x316   :  { %v186_v16 = vmul.f32 %v254_v14, %v185_v15 }
 0x318   :  { %v187_v17 = vmul.f32 0.5, %v186_v16 }
 0x31a   :  { %v188_v18 = vsub.f32 1.5, %v187_v17 }
 0x31c   :  { %v189_v19 = vmul.f32 %v254_v14, %v188_v18 }
 0x31e   :  { %v190_v20 = vmul.f32 %v189_v19, %v183_v13 }
 0x320   :  { %v192_v22 = vsel %vm191_vm4, %v183_v13, %v190_v20 }
 0x321   :  { %v195_v23 = vsel %vm193_vm5, %v194_v21, %v192_v22 }
 0x322   :  { %241 = vpush %v195_v23 }
 0x353   :  { %s242_s24 = spop %241 }
 0x354   :  { %v197_v24 = vstv %s242_s24 }
 0x355   :  { %255 = vrcp.f32 %v197_v24  ;;  %v209_v28 = vand.u32 2147483648, %v197_v24  ;;  %v207_v30 = vand.u32 2147483647, %v197_v24  ;;  %vm203_vm7 = vweird.f32 %v197_v24 }
 0x357   :  { %v210_v32 = vor.u32 1.1754944e-38, %v209_v28  ;;  %vm208_vm9 = vcmp.eq.f32.partialorder %v207_v30, 8.507059e+37 }
 0x35b   :  { %v256_v25 = vpop.eup %255 }
 0x35c   :  { %v199_v26 = vmul.f32 %v256_v25, %v197_v24  ;;  %vm204_vm6 = vweird.f32 %v256_v25 }
 0x35d   :  { %vm205_vm8 = vmor %vm203_vm7, %vm204_vm6 }
 0x35e   :  { %v200_v27 = vsub.f32 1.0, %v199_v26 }
 0x360   :  { %v201_v29 = vmul.f32 %v256_v25, %v200_v27 }
 0x362   :  { %v202_v31 = vadd.f32 %v256_v25, %v201_v29 }
 0x364   :  { %v206_v33 = vsel %vm205_vm8, %v256_v25, %v202_v31 }
 0x365   :  { %v211_v34 = vsel %vm208_vm9, %v210_v32, %v206_v33 }
 0x366   :  { %v212_v35 = vmul.f32 %v211_v34, %v162_v60 }
 0x368   :  { %v213_v36 = vadd.f32 1e-10, %v212_v35 }
 0x36a   :  { %214 = vst.msk [vmem:[#allocation2] sm:$0xf] %vm141_vm1, %v213_v36 }
 0x36b   :  { %225 = dma.vmem_to_hbm [thread:$0]  %s221_s26, 64, %s223_s29, [#allocation3]  }
 0x36c   :  { %281 = dma.done.wait [#allocation3], 64  }
 0x36d   :  { %282 = vsyncadd [#allocation3], 4294967232 }
 0x36e   :  { %230 = vsyncpa [#allocation3], 1 }

</bundles_post_ra>
